<compile_context>
chip_gen: v7x
topology: tpu7x:2x2x1
jax: 0.10.0
libtpu: 0.0.40
codegen_flags: <defaults>
</compile_context>

<pallas_src>
import functools

import jax
import jax.numpy as jnp
from jax.experimental import pallas as pl
from jax.experimental.pallas import tpu as pltpu


def _pick_tile(dim, preferred):
    """Largest preferred (MXU/lane aligned) tile that evenly divides dim, else full dim."""
    for t in preferred:
        if t <= dim and dim % t == 0:
            return t
    return dim


# ---------------------------------------------------------------------------
# Tiled linear:  y = (x @ W + b) * out_scale
# ---------------------------------------------------------------------------
def _linear_kernel(x_ref, w_ref, b_ref, o_ref, acc_ref, *, out_scale):
    k = pl.program_id(2)

    @pl.when(k == 0)
    def _():
        acc_ref[...] = jnp.zeros_like(acc_ref)

    acc_ref[...] += jnp.dot(x_ref[...], w_ref[...],
                            preferred_element_type=jnp.float32)

    @pl.when(k == pl.num_programs(2) - 1)
    def _():
        out = acc_ref[...] + b_ref[...].astype(jnp.float32)
        if out_scale != 1.0:
            out = out * jnp.float32(out_scale)
        o_ref[...] = out.astype(o_ref.dtype)


def _linear(x, w, b, *, out_dtype, compute_dtype, out_scale=1.0):
    """x: (M, K), w: (K, N) pre-transposed vs nn.Linear, b: (1, N)."""
    M, K = x.shape
    N = w.shape[1]
    x = x.astype(compute_dtype)
    w = w.astype(compute_dtype)
    b = b.astype(jnp.float32)

    tm = _pick_tile(M, (256, 128))
    tn = _pick_tile(N, (256, 128))   # lane-dense output tiles when N % 128 == 0
    tk = _pick_tile(K, (512, 256, 128))

    kernel = functools.partial(_linear_kernel, out_scale=float(out_scale))
    return pl.pallas_call(
        kernel,
        out_shape=jax.ShapeDtypeStruct((M, N), out_dtype),
        grid=(M // tm, N // tn, K // tk),
        in_specs=[
            pl.BlockSpec((tm, tk), lambda i, j, k: (i, k)),
            pl.BlockSpec((tk, tn), lambda i, j, k: (k, j)),
            pl.BlockSpec((1, tn), lambda i, j, k: (0, j)),
        ],
        out_specs=pl.BlockSpec((tm, tn), lambda i, j, k: (i, j)),
        scratch_shapes=[pltpu.VMEM((tm, tn), jnp.float32)],
        compiler_params=pltpu.CompilerParams(
            dimension_semantics=("parallel", "parallel", "arbitrary")),
    )(x, w, b)


# ---------------------------------------------------------------------------
# Flash-style attention over pre-projected heads.
# ---------------------------------------------------------------------------
def _flash_kernel(q_ref, k_ref, v_ref, mask_ref, o_ref,
                  m_sc, l_sc, acc_sc, *, precise):
    ki = pl.program_id(3)

    @pl.when(ki == 0)
    def _():
        m_sc[...] = jnp.full_like(m_sc, -1e30)
        l_sc[...] = jnp.zeros_like(l_sc)
        acc_sc[...] = jnp.zeros_like(acc_sc)

    # (tq, tk) scores; contract last dims of q/k — no explicit K transpose.
    s = jax.lax.dot_general(q_ref[...], k_ref[...],
                            (((1,), (1,)), ((), ())),
                            preferred_element_type=jnp.float32)
    keep = mask_ref[...] != 0.0                       # masked_fill(mask == 0, -inf)
    s = jnp.where(keep, s, jnp.float32(-1e30))

    m_prev = m_sc[...]
    m_new = jnp.maximum(m_prev, jnp.max(s, axis=-1, keepdims=True))
    alpha = jnp.exp(m_prev - m_new)
    # post-softmax masked_fill(mask == 0, 0) is folded in here.
    p = jnp.where(keep, jnp.exp(s - m_new), 0.0)

    l_sc[...] = alpha * l_sc[...] + jnp.sum(p, axis=-1, keepdims=True)
    acc_sc[...] = alpha * acc_sc[...] + jnp.dot(
        p.astype(v_ref.dtype), v_ref[...], preferred_element_type=jnp.float32)
    m_sc[...] = m_new

    @pl.when(ki == pl.num_programs(3) - 1)
    def _():
        l = l_sc[...]
        l = jnp.where(l == 0.0, 1.0, l)               # fully-masked rows -> 0 output
        if precise:
            inv = 1.0 / l
        else:
            inv = pl.reciprocal(l, approx=True)       # EUP slot, frees the VALU
        o_ref[...] = (acc_sc[...] * inv).astype(o_ref.dtype)


def _flash_attention(qh, kh, vh, mask, *, precise):
    """qh/kh/vh: (B, H, S, d_k) pre-projected (q already scaled); mask: (B, Sq, Sk)."""
    B, H, Sq, dk = qh.shape
    Sk = kh.shape[2]

    tq = _pick_tile(Sq, (256, 128))
    tks = _pick_tile(Sk, (256, 128))

    kernel = functools.partial(_flash_kernel, precise=precise)
    return pl.pallas_call(
        kernel,
        out_shape=jax.ShapeDtypeStruct((B, H, Sq, dk), qh.dtype),
        grid=(B, H, Sq // tq, Sk // tks),
        in_specs=[
            pl.BlockSpec((None, None, tq, dk), lambda b, h, qi, ki: (b, h, qi, 0)),
            pl.BlockSpec((None, None, tks, dk), lambda b, h, qi, ki: (b, h, ki, 0)),
            pl.BlockSpec((None, None, tks, dk), lambda b, h, qi, ki: (b, h, ki, 0)),
            pl.BlockSpec((None, tq, tks), lambda b, h, qi, ki: (b, qi, ki)),
        ],
        out_specs=pl.BlockSpec((None, None, tq, dk),
                               lambda b, h, qi, ki: (b, h, qi, 0)),
        scratch_shapes=[
            pltpu.VMEM((tq, 1), jnp.float32),   # running max
            pltpu.VMEM((tq, 1), jnp.float32),   # running denom
            pltpu.VMEM((tq, dk), jnp.float32),  # running accumulator
        ],
        compiler_params=pltpu.CompilerParams(
            dimension_semantics=("parallel", "parallel", "parallel", "arbitrary")),
    )(qh, kh, vh, mask)


# ---------------------------------------------------------------------------
# Full MultiHeadAttention forward (eval mode).
# ---------------------------------------------------------------------------
def multi_head_attention(q, k, v, mask, params, num_heads, *, precise=True):
    wq, bq, wk, bk, wv, bv, wo, bo = params
    B, Sq, D = q.shape
    Sk = k.shape[1]
    Sv = v.shape[1]
    d_k = D // num_heads
    compute_dtype = jnp.float32 if precise else jnp.bfloat16

    # 1/sqrt(d_k) folded into the Q projection (cheaper than scaling scores).
    q_proj = _linear(q.reshape(B * Sq, D), wq, bq, out_dtype=compute_dtype,
                     compute_dtype=compute_dtype, out_scale=1.0 / (d_k ** 0.5))
    k_proj = _linear(k.reshape(B * Sk, D), wk, bk, out_dtype=compute_dtype,
                     compute_dtype=compute_dtype)
    v_proj = _linear(v.reshape(B * Sv, D), wv, bv, out_dtype=compute_dtype,
                     compute_dtype=compute_dtype)
    # TODO(synk): value_dropout / attention_dropout are identity (eval mode);
    # training-mode dropout would use pltpu.prng_seed / prng_random_bits.

    def split_heads(x, S):  # (B*S, D) -> (B, H, S, d_k); layout plumbing by XLA
        return x.reshape(B, S, num_heads, d_k).transpose(0, 2, 1, 3)

    qh = split_heads(q_proj, Sq)
    kh = split_heads(k_proj, Sk)
    vh = split_heads(v_proj, Sv)

    # TODO(synk): mask could be shipped as int8 (or generated in-kernel for
    # causal masks) to cut its HBM traffic 4x; kept f32 to match module input.
    att = _flash_attention(qh, kh, vh, mask.astype(jnp.float32), precise=precise)

    att = att.transpose(0, 2, 1, 3).reshape(B * Sq, D)   # concat heads
    out = _linear(att, wo, bo, out_dtype=jnp.float32, compute_dtype=compute_dtype)
    return out.reshape(B, Sq, D)


def reference(q, k, v, mask, params, num_heads):
    """Plain-JAX replica of the PyTorch forward (eval mode) for verification."""
    wq, bq, wk, bk, wv, bv, wo, bo = params
    B, Sq, D = q.shape
    d_k = D // num_heads

    def proj(x, w, b):
        y = x @ w + b
        return y.reshape(B, -1, num_heads, d_k).transpose(0, 2, 1, 3)

    qp, kp, vp = proj(q, wq, bq), proj(k, wk, bk), proj(v, wv, bv)
    scores = jnp.einsum('bhqd,bhkd->bhqk', qp, kp) / (d_k ** 0.5)
    m = mask[:, None, :, :]
    scores = jnp.where(m == 0, -jnp.inf, scores)
    p = jax.nn.softmax(scores, axis=-1)
    p = jnp.where(m == 0, 0.0, p)
    att = jnp.einsum('bhqk,bhkd->bhqd', p, vp)
    att = att.transpose(0, 2, 1, 3).reshape(B, Sq, D)
    return att @ wo + bo


if __name__ == "__main__":
    B, S, D, H = 2, 8, 32, 4  # batch, seq, d_model, num_heads

    key = jax.random.PRNGKey(0)
    keys = jax.random.split(key, 12)

    q = jax.random.normal(keys[0], (B, S, D), jnp.float32)
    k = jax.random.normal(keys[1], (B, S, D), jnp.float32)
    v = jax.random.normal(keys[2], (B, S, D), jnp.float32)

    # Causal mask (guarantees at least one valid key per query row).
    mask = jnp.tril(jnp.ones((S, S), jnp.float32))[None].repeat(B, axis=0)

    def linear_params(kw, kb):
        w = 0.1 * jax.random.normal(kw, (D, D), jnp.float32)  # pre-transposed
        b = 0.1 * jax.random.normal(kb, (1, D), jnp.float32)
        return w, b

    wq, bq = linear_params(keys[3], keys[4])
    wk, bk = linear_params(keys[5], keys[6])
    wv, bv = linear_params(keys[7], keys[8])
    wo, bo = linear_params(keys[9], keys[10])
    params = (wq, bq, wk, bk, wv, bv, wo, bo)

    ref = reference(q, k, v, mask, params, H)

    # Precise path: f32 MXU operands everywhere (tight tolerance vs reference).
    out_f32 = jax.block_until_ready(
        multi_head_attention(q, k, v, mask, params, H, precise=True))
    if not jnp.allclose(out_f32, ref, atol=1e-4, rtol=1e-4):
        raise AssertionError("Pallas MHA (precise) does not match reference")

    # Fast path: bf16 MXU operands, f32 accumulation & f32 softmax (v6e/v7x peak).
    out_bf16 = jax.block_until_ready(
        multi_head_attention(q, k, v, mask, params, H, precise=False))
    if not jnp.allclose(out_bf16, ref, atol=5e-2, rtol=5e-2):
        raise AssertionError("Pallas MHA (bf16 fast path) does not match reference")

    print("KERNEL_OK")
</pallas_src>

<mosaic_0001>
module attributes {stable_mosaic.version = 11 : i64} {
  func.func @_linear_kernel(%arg0: i32, %arg1: i32, %arg2: i32, %arg3: memref<16x32xf32, #tpu.memory_space<vmem>>, %arg4: memref<32x32xf32, #tpu.memory_space<vmem>>, %arg5: memref<1x32xf32, #tpu.memory_space<vmem>>, %arg6: memref<16x32xf32, #tpu.memory_space<vmem>>, %arg7: memref<16x32xf32, #tpu.memory_space<vmem>>) attributes {dimension_semantics = [#tpu.dimension_semantics<parallel>, #tpu.dimension_semantics<parallel>, #tpu.dimension_semantics<arbitrary>], iteration_bounds = array<i64: 1, 1, 1>, scalar_prefetch = 0 : i64, scratch_operands = 1 : i64, tpu.core_type = #tpu.core_type<tc>, window_params = [{transform_indices = @transform_0, window_bounds = array<i64: 16, 32>}, {transform_indices = @transform_1, window_bounds = array<i64: 32, 32>}, {transform_indices = @transform_2, window_bounds = array<i64: 1, 32>}, {transform_indices = @transform_3, window_bounds = array<i64: 16, 32>}]} {
    %c0_i32 = arith.constant 0 : i32
    %0 = arith.cmpi eq, %arg2, %c0_i32 : i32
    %1 = arith.extui %0 : i1 to i32
    %c0_i32_0 = arith.constant 0 : i32
    %2 = arith.cmpi ne, %1, %c0_i32_0 : i32
    scf.if %2 {
      %cst_10 = arith.constant 0.000000e+00 : f32
      %12 = vector.broadcast %cst_10 : f32 to vector<16x32xf32>
      %c0_11 = arith.constant 0 : index
      %c0_12 = arith.constant 0 : index
      %13 = vector.load %arg7[%c0_11, %c0_12] : memref<16x32xf32, #tpu.memory_space<vmem>>, vector<16x32xf32>
      tpu.vector_store %arg7[%c0_11, %c0_12], %12 {strides = array<i32>} : memref<16x32xf32, #tpu.memory_space<vmem>>, vector<16x32xf32>,
    } else {
    }
    %c0 = arith.constant 0 : index
    %c0_1 = arith.constant 0 : index
    %3 = vector.load %arg7[%c0, %c0_1] : memref<16x32xf32, #tpu.memory_space<vmem>>, vector<16x32xf32>
    %c0_2 = arith.constant 0 : index
    %c0_3 = arith.constant 0 : index
    %4 = vector.load %arg3[%c0_2, %c0_3] : memref<16x32xf32, #tpu.memory_space<vmem>>, vector<16x32xf32>
    %c0_4 = arith.constant 0 : index
    %c0_5 = arith.constant 0 : index
    %5 = vector.load %arg4[%c0_4, %c0_5] : memref<32x32xf32, #tpu.memory_space<vmem>>, vector<32x32xf32>
    %cst = arith.constant dense<0.000000e+00> : vector<16x32xf32>
    %6 = tpu.matmul %4, %5, %cst {dimension_numbers = #tpu.dot_dimension_numbers<[1], [0], [0], [1], [0, 0, 1, 1], [], []>} : vector<16x32xf32>, vector<32x32xf32>, vector<16x32xf32> -> vector<16x32xf32>
    %7 = arith.addf %3, %6 : vector<16x32xf32>
    %c0_6 = arith.constant 0 : index
    %c0_7 = arith.constant 0 : index
    %8 = vector.load %arg7[%c0_6, %c0_7] : memref<16x32xf32, #tpu.memory_space<vmem>>, vector<16x32xf32>
    tpu.vector_store %arg7[%c0_6, %c0_7], %7 {strides = array<i32>} : memref<16x32xf32, #tpu.memory_space<vmem>>, vector<16x32xf32>,
    %c0_i32_8 = arith.constant 0 : i32
    %9 = arith.cmpi eq, %arg2, %c0_i32_8 : i32
    %10 = arith.extui %9 : i1 to i32
    %c0_i32_9 = arith.constant 0 : i32
    %11 = arith.cmpi ne, %10, %c0_i32_9 : i32
    scf.if %11 {
      %c0_10 = arith.constant 0 : index
      %c0_11 = arith.constant 0 : index
      %12 = vector.load %arg7[%c0_10, %c0_11] : memref<16x32xf32, #tpu.memory_space<vmem>>, vector<16x32xf32>
      %c0_12 = arith.constant 0 : index
      %c0_13 = arith.constant 0 : index
      %13 = vector.load %arg5[%c0_12, %c0_13] : memref<1x32xf32, #tpu.memory_space<vmem>>, vector<1x32xf32>
      %14 = vector.broadcast %13 : vector<1x32xf32> to vector<16x32xf32>
      %15 = arith.addf %12, %14 : vector<16x32xf32>
      %cst_14 = arith.constant 0.353553385 : f32
      %16 = vector.broadcast %cst_14 : f32 to vector<16x32xf32>
      %17 = arith.mulf %15, %16 : vector<16x32xf32>
      %c0_15 = arith.constant 0 : index
      %c0_16 = arith.constant 0 : index
      %18 = vector.load %arg6[%c0_15, %c0_16] : memref<16x32xf32, #tpu.memory_space<vmem>>, vector<16x32xf32>
      tpu.vector_store %arg6[%c0_15, %c0_16], %17 {strides = array<i32>} : memref<16x32xf32, #tpu.memory_space<vmem>>, vector<16x32xf32>,
    } else {
    }
    return
  }
  func.func @transform_0(%arg0: i32, %arg1: i32, %arg2: i32) -> (i32, i32) {
    %c0_i32 = arith.constant 0 : i32
    return %arg0, %arg2 : i32, i32
  }
  func.func @transform_1(%arg0: i32, %arg1: i32, %arg2: i32) -> (i32, i32) {
    %c0_i32 = arith.constant 0 : i32
    return %arg2, %arg1 : i32, i32
  }
  func.func @transform_2(%arg0: i32, %arg1: i32, %arg2: i32) -> (i32, i32) {
    %c0_i32 = arith.constant 0 : i32
    %c0_i32_0 = arith.constant 0 : i32
    return %c0_i32, %arg1 : i32, i32
  }
  func.func @transform_3(%arg0: i32, %arg1: i32, %arg2: i32) -> (i32, i32) {
    %c0_i32 = arith.constant 0 : i32
    return %arg0, %arg1 : i32, i32
  }
}

</mosaic_0001>

<bundles_post_ra>
// kernel: tpu_custom_call.1
= control target key start
LH: loop header
LB: loop body
LE: loop exit
PB: predicated region body
PF: predicated region fallthrough
CT: control target
= control target key end

     0   :  { %8 = vsyncpa [#allocation4], 0  ;;  %s368_s0 = inlined_call_operand.hbm [shape: f32[16,32], index: 0, kind: input, shape index: {}]   ;;  %s369_s1 = inlined_call_operand.hbm [shape: f32[32,32], index: 1, kind: input, shape index: {}]   ;;  %s370_s2 = inlined_call_operand.vmem [shape: f32[1,32], index: 2, kind: input, shape index: {}]   ;;  %s371_s3 = inlined_call_operand.hbm [shape: f32[16,32], index: 3, kind: output, shape index: {}]  }
   0x1   :  { %9 = vsyncpa [#allocation7], 0 }
   0x2   :  { %10 = vsyncpa [#allocation5], 0  ;;  %s286_s12 = smov [#allocation3]   ;;  %s214_s16 = scalar_lea.hbm %s368_s0, 256 }
   0x3   :  { %s16_s13 = sshll.u32 %s286_s12, 4  ;;  %p215_p0 = scmp.ne.s32.totalorder %s368_s0, %s214_s16  ;;  %s17_s13 = int_to_ptr.vmem [resolvable:$true] %s16_s13 }
   0x4   :  { %p218_p1 = scmp.lt.u32.totalorder %s214_s16, %s368_s0 }
   0x6   :  { %p220_p2 = pnand %p218_p1, %p215_p0 }
   0x8   :  { %223 = shalt.err (!%p220_p2)
}
   0x9   :  { %s224_s21 = scalar_lea.vmem %s17_s13, 256  ;;  %p229_p4 = scmp.lt.s32.totalorder %s17_s13, %s17_s13 }
   0xa   :  { %p225_p3 = scmp.ne.s32.totalorder %s17_s13, %s224_s21  ;;  %p230_p5 = scmp.lt.s32.totalorder %s224_s21, %s224_s21 }
   0xc   :  { %p231_p6 = por %p230_p5, %p229_p4 }
   0xe   :  { %p232_p7 = pnand %p231_p6, %p225_p3 }
  0x10   :  { %235 = shalt.err (!%p232_p7)
}
  0x11   :  { %s287_s22 = smov 128   ;;  %s288_s23 = smov 8  }
  0x12   :  { %22 = dma.hbm_to_vmem [thread:$0]  %s368_s0, 256, %s17_s13, [#allocation4], %s287_s22, %s287_s22, %s288_s23  }
  0x13   :  { %s289_s26 = smov [#allocation6]   ;;  %s236_s30 = scalar_lea.hbm %s369_s1, 512 }
  0x14   :  { %s28_s27 = sshll.u32 %s289_s26, 4  ;;  %p237_p8 = scmp.ne.s32.totalorder %s369_s1, %s236_s30  ;;  %s29_s27 = int_to_ptr.vmem [resolvable:$true] %s28_s27 }
  0x15   :  { %p240_p9 = scmp.lt.u32.totalorder %s236_s30, %s369_s1 }
  0x17   :  { %p242_p10 = pnand %p240_p9, %p237_p8 }
  0x19   :  { %245 = shalt.err (!%p242_p10)
}
  0x1a   :  { %s246_s8 = scalar_lea.vmem %s29_s27, 512  ;;  %p251_p12 = scmp.lt.s32.totalorder %s29_s27, %s29_s27 }
  0x1b   :  { %p247_p11 = scmp.ne.s32.totalorder %s29_s27, %s246_s8  ;;  %p252_p13 = scmp.lt.s32.totalorder %s246_s8, %s246_s8 }
  0x1d   :  { %p253_p0 = por %p252_p13, %p251_p12 }
  0x1f   :  { %p254_p1 = pnand %p253_p0, %p247_p11 }
  0x21   :  { %257 = shalt.err (!%p254_p1)
}
  0x22   :  { %34 = dma.hbm_to_vmem [thread:$0]  %s369_s1, 512, %s29_s27, [#allocation7], %s287_s22, %s287_s22, %s288_s23  }
  0x23   :  { %280 = dma.done.wait [#allocation4], 256  }
  0x24   :  { %281 = vsyncadd [#allocation4], 4294967040 }
  0x25   :  { %282 = dma.done.wait [#allocation7], 512  }
  0x26   :  { %283 = vsyncadd [#allocation7], 4294966784  ;;  %vm47_vm0 = vcmask 261120   ;;  %v290_v0 = vmov 0.0   ;;  %v54_v1 = vld [vmem:[#allocation6] sm:$0xff]  ;;  %v55_v2 = vld [vmem:[#allocation6 + $0x8] sm:$0xff] }
  0x27   :  { %49 = vst.msk [vmem:[#allocation2 + $0x8] sm:$0xff] %vm47_vm0, %v290_v0  ;;  %48 = vst.msk [vmem:[#allocation2] sm:$0xff] %vm47_vm0, %v290_v0  ;;  %v56_v3 = vld [vmem:[#allocation6 + $0x10] sm:$0xff]  ;;  %v200_v4 = vpack.c.bf16 %v55_v2, %v54_v1  ;;  %v57_v5 = vld [vmem:[#allocation6 + $0x18] sm:$0xff]  ;;  %s291_s11 = smov [#allocation8]  }
  0x28   :  { %v52_v6 = vld [vmem:[#allocation3] sm:$0xff]  ;;  %v204_v7 = vpack.c.bf16 %v57_v5, %v56_v3  ;;  %v53_v8 = vld [vmem:[#allocation3 + $0x8] sm:$0xff]  ;;  %v182_v15 = vld [vmem:[%s370_s2] ss:$0 sm:$0xff]  ;;  %s167_s12 = sshll.u32 %s291_s11, 4  ;;  %s168_s12 = int_to_ptr.vmem [resolvable:$true] %s167_s12 }
  0x29   :  { %197 = vmatprep.mubr.msk.f32.mxu0 %vm47_vm0, %v52_v6  ;;  %201 = vmatprep.subr.bf16.mxu0 %v200_v4  ;;  %s258_s13 = scalar_lea.vmem %s168_s12, 256  ;;  %p263_p3 = scmp.lt.s32.totalorder %s168_s12, %s168_s12 }
  0x2a   :  { %203 = vmatpush3.bf16.msra.mxu0 %v200_v4  ;;  %p259_p2 = scmp.ne.s32.totalorder %s168_s12, %s258_s13  ;;  %p264_p4 = scmp.lt.s32.totalorder %s258_s13, %s258_s13 }
  0x2b   :  { %205 = vmatprep.subr.bf16.mxu0 %v204_v7 }
  0x2c   :  { %p265_p5 = por %p264_p4, %p263_p3 }
  0x2e   :  { %207 = vmatpush3.bf16.msra.mxu0 %v204_v7  ;;  %v51_v9 = vld [vmem:[#allocation2 + $0x8] sm:$0xff]  ;;  %v50_v10 = vld [vmem:[#allocation2] sm:$0xff]  ;;  %p266_p6 = pnand %p265_p5, %p259_p2 }
  0x31   :  { %198 = vmatmul.mubr.msk.f32.vlgmr.msra.gmra.mrb[0].mxu0 %vm47_vm0, %v53_v8 }
 0x104   :  { %v199_v11 = vpop.f32.mrb[0].mxu0 }
 0x105   :  { %v141_v12 = vadd.f32 %v199_v11, %v51_v9  ;;  %v131_v13 = vpop.f32.mrb[1].mxu0 }
 0x106   :  { %v140_v14 = vadd.f32 %v131_v13, %v50_v10 }
 0x107   :  { %143 = vst.msk [vmem:[#allocation2 + $0x8] sm:$0xff] %vm47_vm0, %v141_v12 }
 0x108   :  { %142 = vst.msk [vmem:[#allocation2] sm:$0xff] %vm47_vm0, %v140_v14 }
 0x10e   :  { %v148_v16 = vld [vmem:[#allocation2 + $0x8] sm:$0xff] }
 0x10f   :  { %v147_v17 = vld [vmem:[#allocation2] sm:$0xff]  ;;  %v157_v18 = vadd.f32 %v182_v15, %v148_v16 }
 0x110   :  { %v156_v19 = vadd.f32 %v182_v15, %v147_v17 }
 0x111   :  { %v159_v20 = vmul.f32 0.35355338, %v157_v18 }
 0x112   :  { %v158_v21 = vmul.f32 0.35355338, %v156_v19 }
 0x113   :  { %161 = vst.msk [vmem:[#allocation8 + $0x8] sm:$0xff] %vm47_vm0, %v159_v20 }
 0x114   :  { %160 = vst.msk [vmem:[#allocation8] sm:$0xff] %vm47_vm0, %v158_v21 }
 0x115   :  { %269 = shalt.err (!%p266_p6)
}
 0x116   :  { %s270_s15 = scalar_lea.hbm %s371_s3, 256 }
 0x117   :  { %p271_p7 = scmp.ne.s32.totalorder %s371_s3, %s270_s15  ;;  %p274_p8 = scmp.lt.u32.totalorder %s270_s15, %s371_s3 }
 0x119   :  { %p276_p9 = pnand %p274_p8, %p271_p7 }
 0x11b   :  { %279 = shalt.err (!%p276_p9)
}
 0x11c   :  { %173 = dma.vmem_to_hbm [thread:$0]  %s168_s12, 256, %s371_s3, [#allocation5], %s287_s22, %s287_s22, %s288_s23  }
 0x11d   :  { %284 = dma.done.wait [#allocation5], 256  }
 0x11e   :  { %285 = vsyncadd [#allocation5], 4294967040 }
 0x11f   :  { %177 = vsyncpa [#allocation4], 1 }
 0x120   :  { %178 = vsyncpa [#allocation7], 1 }
 0x121   :  { %179 = vsyncpa [#allocation5], 1 }

</bundles_post_ra>
